<compile_context>
chip_gen: v6e
topology: v6e:2x2x1
jax: 0.10.0
libtpu: 0.0.40
codegen_flags: <defaults>
</compile_context>

<pallas_src>
import math
import functools

import jax
import jax.numpy as jnp
from jax.experimental import pallas as pl
from jax.experimental.pallas import tpu as pltpu


def _round_up(x, m):
    return -(-x // m) * m


def _gaussian_1d(size, sigma):
    """Normalized 1D Gaussian taps as compile-time Python floats.

    The PyTorch __init__ builds the 2D kernel as a product over 'ij' meshgrids
    and normalizes by the total sum; that equals the outer product of the
    per-axis normalized 1D taps, so the depthwise conv is exactly separable.
    """
    mean = (size - 1) / 2.0
    w = [math.exp(-(((i - mean) / sigma) ** 2) / 2.0) for i in range(size)]
    s = sum(w)
    return tuple(wi / s for wi in w)


def _smooth_kernel(x_ref, o_ref, *, gh, gw, hout, wout):
    """Separable valid Gaussian blur on one block of flattened channels.

    x_ref: (TBC, H, W) in VMEM   (sublane dim = H, lane dim = W)
    o_ref: (TBC, Hout, Wout)
    Gaussian weights are baked in as Python floats; accumulation is in f32.
    """
    needs_cast = x_ref.dtype != jnp.float32

    def tap(ky):
        # Per-tap read straight from the ref: no full-tile f32 copy is
        # materialized (frees VMEM budget for a larger channel tile).
        v = x_ref[:, ky:ky + hout, :]
        return v.astype(jnp.float32) if needs_cast else v

    # Pass 1: 1D blur along H (sublane-offset slices).
    tmp = gh[0] * tap(0)
    for ky in range(1, len(gh)):
        tmp = tmp + gh[ky] * tap(ky)

    # Pass 2: 1D blur along W (lane-offset slices; the shifts ride the
    # otherwise-idle XLU while the pipeline is DMA-bound).
    # TODO(synk): for large kernel_size, replace these slices with pltpu.roll
    # (or an MXU matmul against a banded (W, Wout) matrix) if profiling shows
    # the slice relayouts approaching DMA time.
    acc = gw[0] * tmp[:, :, 0:wout]
    for kx in range(1, len(gw)):
        acc = acc + gw[kx] * tmp[:, :, kx:kx + wout]

    o_ref[...] = acc.astype(o_ref.dtype)


def _vmem_plane_bytes(h, w, itemsize):
    """Bytes one (h, w) plane occupies in VMEM under (sublane, lane) tiling."""
    sublane = 8 * max(1, 4 // itemsize)      # f32: 8 rows, bf16: 16, int8: 32
    return _round_up(h, sublane) * _round_up(w, 128) * itemsize


def _vmem_budget_bytes():
    """Generation-aware VMEM limit and per-step working-set budget."""
    cap = 64 * 1024 * 1024                   # conservative fallback (v7x-sized)
    try:
        info_cap = pltpu.get_tpu_info().vmem_capacity_bytes
        if info_cap:
            cap = int(info_cap)
    except Exception:
        pass
    vmem_limit = int(cap * 0.75)             # ~48 MiB on v7x, ~96 MiB on v5e/v6e
    tile_budget = int(vmem_limit * 0.75)
    return vmem_limit, tile_budget


def _choose_channel_tile(bc, per_ch_bytes, tile_budget_bytes):
    """Pick channels-per-grid-step and the resulting number of grid steps."""
    if per_ch_bytes > tile_budget_bytes:
        # TODO(synk): very large H*W needs a second grid axis over H row-bands
        # with a (kh-1)-row halo (overlapping-window BlockSpec); not done here.
        raise ValueError(
            "GaussianSmoothing: one channel's working set "
            f"({per_ch_bytes} B) exceeds the per-step VMEM budget "
            f"({tile_budget_bytes} B); spatial tiling is not implemented.")
    tbc = max(1, min(bc, tile_budget_bytes // per_ch_bytes))
    if bc >= 2:
        # At least two grid steps so both v7x TensorCores get work.
        tbc = min(tbc, -(-bc // 2))
    steps = -(-bc // tbc)
    if bc >= 2 and steps % 2 == 1 and steps < bc:
        # Prefer an even step count (balanced 2-TC split) when it is free.
        alt_tbc = -(-bc // (steps + 1))
        if alt_tbc >= 1 and (-(-bc // alt_tbc)) % 2 == 0:
            tbc = alt_tbc
            steps = -(-bc // tbc)
    return tbc, steps


def gaussian_smoothing(x, channels, kernel_size, sigma, dim=2):
    """Forward of GaussianSmoothing: depthwise valid 2D conv, NCHW in / NCHW out."""
    if dim != 2:
        # TODO(synk): only the dim=2 (F.conv2d) path used by srfbn_mod is implemented.
        raise NotImplementedError("only dim=2 is implemented")
    B, C, H, W = x.shape
    assert C == channels
    if isinstance(kernel_size, (int, float)):
        kernel_size = [int(kernel_size)] * 2
    if isinstance(sigma, (int, float)):
        sigma = [float(sigma)] * 2
    kh, kw = int(kernel_size[0]), int(kernel_size[1])
    assert H >= kh and W >= kw, "kernel_size larger than spatial dims"
    gh = _gaussian_1d(kh, float(sigma[0]))
    gw = _gaussian_1d(kw, float(sigma[1]))
    hout, wout = H - kh + 1, W - kw + 1
    BC = B * C
    elt = x.dtype.itemsize

    # Free, contiguous reshape (no HBM pass, no transpose, no pad).
    xf = x.reshape(BC, H, W)

    vmem_limit, tile_budget = _vmem_budget_bytes()
    per_ch = (
        2 * _vmem_plane_bytes(H, W, elt)            # input block, double-buffered
        + 2 * _vmem_plane_bytes(hout, wout, elt)    # output block, double-buffered
        + _vmem_plane_bytes(hout, W, 4)             # f32 H-pass intermediate
        + _vmem_plane_bytes(hout, wout, 4)          # f32 accumulator
        + 2 * _vmem_plane_bytes(hout, W, 4)         # per-tap temporaries / slack
    )
    tbc, steps = _choose_channel_tile(BC, per_ch, tile_budget)

    cost = pl.CostEstimate(
        flops=2 * BC * (kh * hout * W + kw * hout * wout),
        transcendentals=0,
        bytes_accessed=BC * (H * W + hout * wout) * elt,
    )

    out = pl.pallas_call(
        functools.partial(_smooth_kernel, gh=gh, gw=gw, hout=hout, wout=wout),
        out_shape=jax.ShapeDtypeStruct((BC, hout, wout), x.dtype),
        grid=(steps,),
        in_specs=[pl.BlockSpec((tbc, H, W), lambda i: (i, 0, 0))],
        out_specs=pl.BlockSpec((tbc, hout, wout), lambda i: (i, 0, 0)),
        compiler_params=pltpu.CompilerParams(
            dimension_semantics=("parallel",),
            vmem_limit_bytes=vmem_limit,
        ),
        cost_estimate=cost,
    )(xf)

    # Free reshape back to NCHW.
    return out.reshape(B, C, hout, wout)


def _reference(x, channels, kernel_size, sigma):
    """Pure-JAX reference reproducing the PyTorch 2D-kernel construction."""
    if isinstance(kernel_size, (int, float)):
        kernel_size = [int(kernel_size)] * 2
    if isinstance(sigma, (int, float)):
        sigma = [float(sigma)] * 2
    grids = jnp.meshgrid(
        *[jnp.arange(s, dtype=jnp.float32) for s in kernel_size], indexing="ij"
    )
    k = jnp.ones((), jnp.float32)
    for size, std, mgrid in zip(kernel_size, sigma, grids):
        mean = (size - 1) / 2.0
        k = k * (1.0 / (std * math.sqrt(2.0 * math.pi))
                 * jnp.exp(-(((mgrid - mean) / std) ** 2) / 2.0))
    k = k / jnp.sum(k)
    kh, kw = int(k.shape[0]), int(k.shape[1])
    hout, wout = x.shape[2] - kh + 1, x.shape[3] - kw + 1
    acc = jnp.zeros((x.shape[0], x.shape[1], hout, wout), jnp.float32)
    for ky in range(kh):
        for kx in range(kw):
            acc = acc + k[ky, kx] * x[:, :, ky:ky + hout, kx:kx + wout]
    return acc.astype(x.dtype)


if __name__ == "__main__":
    key = jax.random.PRNGKey(0)

    # Primary check: the module's intended small shape.
    B, C, H, W = 2, 4, 16, 16
    kernel_size, sigma = 3, 1.5
    x = jax.random.normal(key, (B, C, H, W), dtype=jnp.float32)
    out = gaussian_smoothing(x, channels=C, kernel_size=kernel_size, sigma=sigma)
    out = jax.block_until_ready(out)
    ref = _reference(x, C, kernel_size, sigma)
    assert out.shape == (B, C, H - kernel_size + 1, W - kernel_size + 1)
    assert jnp.allclose(out, ref, atol=1e-5, rtol=1e-5)

    # Secondary check: odd channel count (exercises the partial last channel
    # block — no padding pass anymore) and a larger Gaussian kernel.
    x2 = jax.random.normal(jax.random.PRNGKey(0), (1, 3, 20, 28), dtype=jnp.float32)
    out2 = gaussian_smoothing(x2, channels=3, kernel_size=5, sigma=2.0)
    out2 = jax.block_until_ready(out2)
    ref2 = _reference(x2, 3, 5, 2.0)
    assert out2.shape == (1, 3, 16, 24)
    assert jnp.allclose(out2, ref2, atol=1e-5, rtol=1e-5)

    print("KERNEL_OK")
</pallas_src>

<mosaic_0001>
module attributes {stable_mosaic.version = 11 : i64} {
  func.func @_smooth_kernel(%arg0: i32, %arg1: memref<4x16x16xf32, #tpu.memory_space<vmem>>, %arg2: memref<4x14x14xf32, #tpu.memory_space<vmem>>) attributes {dimension_semantics = [#tpu.dimension_semantics<parallel>], iteration_bounds = array<i64: 2>, scalar_prefetch = 0 : i64, scratch_operands = 0 : i64, tpu.core_type = #tpu.core_type<tc>, window_params = [{transform_indices = @transform_0, window_bounds = array<i64: 4, 16, 16>}, {transform_indices = @transform_1, window_bounds = array<i64: 4, 14, 14>}]} {
    %c0 = arith.constant 0 : index
    %c0_0 = arith.constant 0 : index
    %c0_1 = arith.constant 0 : index
    %0 = vector.load %arg1[%c0, %c0_0, %c0_1] : memref<4x16x16xf32, #tpu.memory_space<vmem>>, vector<4x14x16xf32>
    %cst = arith.constant 0.307801336 : f32
    %1 = vector.broadcast %cst : f32 to vector<4x14x16xf32>
    %2 = arith.mulf %1, %0 : vector<4x14x16xf32>
    %c0_2 = arith.constant 0 : index
    %c1 = arith.constant 1 : index
    %c0_3 = arith.constant 0 : index
    %3 = vector.load %arg1[%c0_2, %c1, %c0_3] : memref<4x16x16xf32, #tpu.memory_space<vmem>>, vector<4x14x16xf32>
    %cst_4 = arith.constant 0.384397328 : f32
    %4 = vector.broadcast %cst_4 : f32 to vector<4x14x16xf32>
    %5 = arith.mulf %4, %3 : vector<4x14x16xf32>
    %6 = arith.addf %2, %5 : vector<4x14x16xf32>
    %c0_5 = arith.constant 0 : index
    %c2 = arith.constant 2 : index
    %c0_6 = arith.constant 0 : index
    %7 = vector.load %arg1[%c0_5, %c2, %c0_6] : memref<4x16x16xf32, #tpu.memory_space<vmem>>, vector<4x14x16xf32>
    %cst_7 = arith.constant 0.307801336 : f32
    %8 = vector.broadcast %cst_7 : f32 to vector<4x14x16xf32>
    %9 = arith.mulf %8, %7 : vector<4x14x16xf32>
    %10 = arith.addf %6, %9 : vector<4x14x16xf32>
    %11 = vector.extract_strided_slice %10 {offsets = [0, 0, 0], sizes = [4, 14, 14], strides = [1, 1, 1]} : vector<4x14x16xf32> to vector<4x14x14xf32>
    %cst_8 = arith.constant 0.307801336 : f32
    %12 = vector.broadcast %cst_8 : f32 to vector<4x14x14xf32>
    %13 = arith.mulf %12, %11 : vector<4x14x14xf32>
    %14 = vector.extract_strided_slice %10 {offsets = [0, 0, 1], sizes = [4, 14, 14], strides = [1, 1, 1]} : vector<4x14x16xf32> to vector<4x14x14xf32>
    %cst_9 = arith.constant 0.384397328 : f32
    %15 = vector.broadcast %cst_9 : f32 to vector<4x14x14xf32>
    %16 = arith.mulf %15, %14 : vector<4x14x14xf32>
    %17 = arith.addf %13, %16 : vector<4x14x14xf32>
    %18 = vector.extract_strided_slice %10 {offsets = [0, 0, 2], sizes = [4, 14, 14], strides = [1, 1, 1]} : vector<4x14x16xf32> to vector<4x14x14xf32>
    %cst_10 = arith.constant 0.307801336 : f32
    %19 = vector.broadcast %cst_10 : f32 to vector<4x14x14xf32>
    %20 = arith.mulf %19, %18 : vector<4x14x14xf32>
    %21 = arith.addf %17, %20 : vector<4x14x14xf32>
    %c0_11 = arith.constant 0 : index
    %c0_12 = arith.constant 0 : index
    %c0_13 = arith.constant 0 : index
    %22 = vector.load %arg2[%c0_11, %c0_12, %c0_13] : memref<4x14x14xf32, #tpu.memory_space<vmem>>, vector<4x14x14xf32>
    tpu.vector_store %arg2[%c0_11, %c0_12, %c0_13], %21 {strides = array<i32>} : memref<4x14x14xf32, #tpu.memory_space<vmem>>, vector<4x14x14xf32>,
    return
  }
  func.func @transform_0(%arg0: i32) -> (i32, i32, i32) {
    %c0_i32 = arith.constant 0 : i32
    %c0_i32_0 = arith.constant 0 : i32
    %c0_i32_1 = arith.constant 0 : i32
    return %arg0, %c0_i32, %c0_i32_0 : i32, i32, i32
  }
  func.func @transform_1(%arg0: i32) -> (i32, i32, i32) {
    %c0_i32 = arith.constant 0 : i32
    %c0_i32_0 = arith.constant 0 : i32
    %c0_i32_1 = arith.constant 0 : i32
    return %arg0, %c0_i32, %c0_i32_0 : i32, i32, i32
  }
}

</mosaic_0001>

<bundles_post_ra>
// kernel: tpu_custom_call.1
= control target key start
LH: loop header
LB: loop body
LE: loop exit
PB: predicated region body
PF: predicated region fallthrough
CT: control target
= control target key end

     0   :  { %6 = vsyncpa [#allocation3], 0  ;;  %s677_s0 = inlined_call_operand.hbm [shape: f32[8,16,16], index: 0, kind: input, shape index: {}]   ;;  %s678_s1 = inlined_call_operand.vmem [shape: f32[8,14,14], index: 1, kind: output, shape index: {}]  }
   0x1   :  { %8 = vsyncpa [#allocation3 + $0x1], 0  ;;  %s521_s6 = smov 0   ;;  %s523_s7 = smov 0  }
   0x2   :  { %s525_s8 = smov 0   ;;  %s527_s9 = smov 0  }
   0x3 LB: > { %s381_s10 = sadd.s32 4294967295, %s504_s9   ;;  %s541_s11 = sadd.s32 1, %s504_s9   ;;  %s504_s9 = sphi %s527_s9, %s687_s9   ;;  %s500_s8 = sphi %s525_s8, %s686_s8   ;;  %s496_s7 = sphi %s523_s7, %s685_s7   ;;  %s492_s6 = sphi %s521_s6, %s684_s6  }
   0x4   : > { %s18_s12 = ssub.s32 %s504_s9, %s541_s11  ;;  %s21_s13 = sadd.s32 1, %s500_s8 }
   0x5   : > { %p19_p0 = scmp.eq.s32.totalorder %s18_s12, 0  ;;  %p28_p1 = scmp.ne.s32.totalorder %s500_s8, %s496_s7 }
   0x6   : > { %p29_p2 = scmp.eq.s32.totalorder %s504_s9, 0  ;;  %p34_p3 = scmp.ne.s32.totalorder %s496_s7, %s492_s6 }
   0x7   : > { %s551_s14 = scalar_select %p19_p0, %s500_s8, %s21_s13  }
   0x8   : > { %p30_p4 = por %p29_p2, %p28_p1  ;;  %p35_p5 = scmp.eq.s32.totalorder %s381_s10, 0 }
   0x9   : > { %p405_p6 = scmp.lt.s32.totalorder %s504_s9, 2  ;;  %s84_s16 = sand.u32 1, %s500_s8  }
   0xa   : > { %p556_p7 = por %p35_p5, %p34_p3  ;;  %s385_s17 = sshll.u32 %s84_s16, 6 }
   0xb   : > { %s397_s18 = sshll.u32 %s504_s9, 10  ;;  %s88_s22 = scalar_lea.vmem [#allocation2], %s385_s17 }
   0xc   : > { %s680_s15 = scalar_select %p556_p7, 1, 0 }
   0xd   : > { %s565_s21 = scalar_lea.hbm %s677_s0, %s397_s18  ;;  %s96_s23 = sshll.u32 %s88_s22, 4  ;;  %s567_s23 = int_to_ptr.vmem [resolvable:$true] %s96_s23 }
   0xe   : > { %p569_p8 = pnand %p405_p6, %p30_p4  ;;  %s574_s25 = scalar_lea.sflag [#allocation3], %s84_s16 }
   0xf   : > { %s442_s26 = scalar_lea.hbm %s565_s21, 1024  ;;  %s447_s29 = scalar_lea.hbm %s677_s0, 2048 }
  0x10   : > { %p443_p10 = scmp.ne.s32.totalorder %s565_s21, %s442_s26  ;;  %p444_p11 = pneg %p569_p8 }
  0x11   : > { %p448_p0 = scmp.lt.s32.totalorder %s565_s21, %s677_s0  ;;  %p449_p1 = scmp.lt.s32.totalorder %s447_s29, %s442_s26 }
  0x12   : > { %p445_p12 = pnand %p444_p11, %p443_p10 }
  0x13   : > { %p450_p2 = por %p449_p1, %p448_p0 }
  0x14   : > { %p446_p13 = pneg %p445_p12 }
  0x16   : > { %p451_p3 = pnand %p450_p2, %p446_p13 }
  0x18   : > { %454 = shalt.err (!%p451_p3)
}
  0x19   : > { %s455_s3 = scalar_lea.vmem %s567_s23, 1024  ;;  %s506_s4 = smov [#allocation2]  }
  0x1a   : > { %p456_p4 = scmp.ne.s32.totalorder %s567_s23, %s455_s3  ;;  %s460_s5 = sshll.u32 %s506_s4, 4  ;;  %s461_s5 = int_to_ptr.vmem [resolvable:$false] %s460_s5 }
  0x1b   : > { %s462_s6 = scalar_lea.vmem %s461_s5, 2048  ;;  %p463_p10 = scmp.lt.s32.totalorder %s567_s23, %s461_s5 }
  0x1c   : > { %p458_p5 = pnand %p456_p4, %p444_p11  ;;  %p464_p12 = scmp.lt.s32.totalorder %s462_s6, %s455_s3 }
  0x1e   : > { %p459_p6 = pneg %p458_p5  ;;  %p465_p9 = por %p464_p12, %p463_p10 }
  0x20   : > { %p466_p7 = pnand %p465_p9, %p459_p6 }
  0x22   : > { %469 = shalt.err (!%p466_p7)
}
  0x23   : > { %s507_s12 = smov 128   ;;  %s508_s13 = smov 8  }
  0x24   : > { %404 = dma.hbm_to_vmem [thread:$0]  (!%p569_p8), %s565_s21, 1024, %s567_s23, %s574_s25, %s507_s12, %s507_s12, %s508_s13  }
  0x25   : > { %p104_p11 = scmp.lt.s32.totalorder %s504_s9, 3  ;;  %p682_p13 = scmp.ge.s32.totalorder %s504_s9, 1 }
  0x27   : > { %p105_p0 = pnand %p682_p13, %p104_p11 }
  0x28   : > { %s110_s16 = sand.u32 (!%p105_p0), 1, %s496_s7   ;;  %p683_p7 = scmp.ne.s32.totalorder (!%p105_p0), %s680_s15, 0 }
  0x29   : > { %108 = sbr.rel (%p105_p0) target bundleno = 204 (0xcc), region = 24  ;;  %s390_s17 = sshll.u32 (!%p105_p0), %s110_s16, 6 }
  0x2a   : > { %s111_s18 = scalar_lea.sflag (!%p105_p0), [#allocation3], %s110_s16  ;;  %s599_s19 = scalar_lea.vmem (!%p105_p0), [#allocation2], %s390_s17 }
  0x2e   : > { %487 = dma.done.wait (%p683_p7), %s111_s18, 1024  }
  0x2f   : > { %489 = vsyncadd (%p683_p7), %s111_s18, 4294966272  ;;  %v144_v0 = vld [vmem:[%s599_s19 + $0x10] sm:$0xff]  ;;  %v142_v6 = vld [vmem:[%s599_s19] sm:$0xff]  ;;  %s509_s15 = smov 127   ;;  %s510_s20 = smov 126   ;;  %vm304_vm0 = vcmask 111616  }
  0x30   : > { %v160_v1 = vld [vmem:[%s599_s19 + $0x11] sm:$0xff]  ;;  %v152_v3 = vmul.f32 0.30780134, %v144_v0  ;;  %v158_v7 = vld [vmem:[%s599_s19 + $0x1] sm:$0xff]  ;;  %v150_v10 = vmul.f32 0.30780134, %v142_v6 }
  0x31   : > { %v184_v2 = vld [vmem:[%s599_s19 + $0x12] sm:$0xff]  ;;  %v168_v4 = vmul.f32 0.38439733, %v160_v1  ;;  %v182_v8 = vld [vmem:[%s599_s19 + $0x2] sm:$0xff]  ;;  %v166_v11 = vmul.f32 0.38439733, %v158_v7 }
  0x32   : > { %v192_v5 = vmul.f32 0.30780134, %v184_v2  ;;  %v190_v12 = vmul.f32 0.30780134, %v182_v8  ;;  %v145_v13 = vld [vmem:[%s599_s19 + $0x18] sm:$0x3f] }
  0x33   : > { %v176_v9 = vadd.f32 %v168_v4, %v152_v3  ;;  %v161_v14 = vld [vmem:[%s599_s19 + $0x19] sm:$0x3f]  ;;  %v174_v17 = vadd.f32 %v166_v11, %v150_v10  ;;  %v153_v18 = vmul.f32 0.30780134, %v145_v13  ;;  %v143_v20 = vld [vmem:[%s599_s19 + $0x8] sm:$0x3f] }
  0x34   : > { %v185_v15 = vld [vmem:[%s599_s19 + $0x1a] sm:$0x3f]  ;;  %v169_v19 = vmul.f32 0.38439733, %v161_v14  ;;  %v151_v22 = vmul.f32 0.30780134, %v143_v20 }
  0x35   : > { %v614_v16 = vadd.f32 %v192_v5, %v176_v9  ;;  %v193_v21 = vmul.f32 0.30780134, %v185_v15  ;;  %v159_v23 = vld [vmem:[%s599_s19 + $0x9] sm:$0x3f]  ;;  %v198_v25 = vadd.f32 %v190_v12, %v174_v17  ;;  %v146_v39 = vld [vmem:[%s599_s19 + $0x20] sm:$0xff]  ;;  %v148_v48 = vld [vmem:[%s599_s19 + $0x30] sm:$0xff] }
  0x36   : > { %v177_v26 = vadd.f32 %v169_v19, %v153_v18  ;;  %v167_v27 = vmul.f32 0.38439733, %v159_v23  ;;  %v183_v28 = vld [vmem:[%s599_s19 + $0xa] sm:$0x3f]  ;;  %v162_v40 = vld [vmem:[%s599_s19 + $0x21] sm:$0xff]  ;;  %v164_v61 = vld [vmem:[%s599_s19 + $0x31] sm:$0xff] }
  0x37   : > { %v216_v24 = vmul.f32 0.38439733, %v614_v16  ;;  %v191_v29 = vmul.f32 0.30780134, %v183_v28  ;;  %v147_v30 = vld [vmem:[%s599_s19 + $0x28] sm:$0x3f] }
  0x38   : > { %v163_v31 = vld [vmem:[%s599_s19 + $0x29] sm:$0x3f]  ;;  %v214_v32 = vmul.f32 0.38439733, %v198_v25  ;;  %v201_v33 = vadd.f32 %v193_v21, %v177_v26  ;;  %v175_v34 = vadd.f32 %v167_v27, %v151_v22  ;;  %v155_v35 = vmul.f32 0.30780134, %v147_v30 }
  0x39   : > { %234 = vrot.lane.b32.xlu1 %v216_v24, %s509_s15  ;;  %v187_v36 = vld [vmem:[%s599_s19 + $0x2a] sm:$0x3f]  ;;  %v171_v37 = vmul.f32 0.38439733, %v163_v31  ;;  %v154_v43 = vmul.f32 0.30780134, %v146_v39 }
  0x3a   : > { %v195_v38 = vmul.f32 0.30780134, %v187_v36  ;;  %230 = vrot.lane.b32.xlu0 %v214_v32, %s509_s15  ;;  %v217_v41 = vmul.f32 0.38439733, %v201_v33  ;;  %v199_v42 = vadd.f32 %v191_v29, %v175_v34  ;;  %v170_v44 = vmul.f32 0.38439733, %v162_v40 }
  0x3b   : > { %v179_v45 = vadd.f32 %v171_v37, %v155_v35  ;;  %v186_v46 = vld [vmem:[%s599_s19 + $0x22] sm:$0xff]  ;;  %v149_v47 = vld [vmem:[%s599_s19 + $0x38] sm:$0x3f]  ;;  %v156_v59 = vmul.f32 0.30780134, %v148_v48  ;;  %s391_s21 = sshll.u32 %s381_s10, 2 }
  0x3c   : > { %v215_v49 = vmul.f32 0.38439733, %v199_v42  ;;  %v178_v50 = vadd.f32 %v170_v44, %v154_v43  ;;  %v194_v51 = vmul.f32 0.30780134, %v186_v46  ;;  %v157_v53 = vmul.f32 0.30780134, %v149_v47 }
  0x3d   : > { %236 = vrot.lane.b32.xlu1 %v217_v41, %s509_s15  ;;  %v203_v52 = vadd.f32 %v195_v38, %v179_v45  ;;  %v165_v54 = vld [vmem:[%s599_s19 + $0x39] sm:$0x3f]  ;;  %v172_v1 = vmul.f32 0.38439733, %v164_v61  ;;  %v207_v3 = vmul.f32 0.30780134, %v199_v42 }
  0x3e   : > { %v189_v55 = vld [vmem:[%s599_s19 + $0x3a] sm:$0x3f]  ;;  %232 = vrot.lane.b32.xlu0 %v215_v49, %s509_s15  ;;  %v202_v56 = vadd.f32 %v194_v51, %v178_v50  ;;  %v173_v57 = vmul.f32 0.38439733, %v165_v54  ;;  %v188_v62 = vld [vmem:[%s599_s19 + $0x32] sm:$0xff]  ;;  %p136_p8 = scmp.lt.s32.totalorder %s391_s21, 7 }
  0x3f   : > { %v197_v58 = vmul.f32 0.30780134, %v189_v55  ;;  %v219_v60 = vmul.f32 0.38439733, %v203_v52  ;;  %v196_v2 = vmul.f32 0.30780134, %v188_v62  ;;  %v180_v6 = vadd.f32 %v172_v1, %v156_v59 }
  0x40   : > { %v218_v63 = vmul.f32 0.38439733, %v202_v56  ;;  %v181_v0 = vadd.f32 %v173_v57, %v157_v53  ;;  %v206_v4 = vmul.f32 0.30780134, %v198_v25  ;;  %v209_v10 = vmul.f32 0.30780134, %v201_v33 }
  0x41   : > { %240 = vrot.lane.b32.xlu1 %v219_v60, %s509_s15  ;;  %v204_v7 = vadd.f32 %v196_v2, %v180_v6  ;;  %v208_v11 = vmul.f32 0.30780134, %v614_v16  ;;  %v211_v12 = vmul.f32 0.30780134, %v203_v52  ;;  %v210_v13 = vmul.f32 0.30780134, %v202_v56 }
  0x42   : > { %238 = vrot.lane.b32.xlu0 %v218_v63, %s509_s15  ;;  %v205_v5 = vadd.f32 %v197_v58, %v181_v0  ;;  %s689_s21 = smov (!%p136_p8, %s391_s21), 7  ;;  %vm302_vm1 = vcmask 113664  }
  0x43   : > { %v220_v9 = vmul.f32 0.38439733, %v204_v7  ;;  %v212_v15 = vmul.f32 0.30780134, %v204_v7  ;;  %s398_s22 = sshll.u32 %s689_s21, 4 }
  0x44   : > { %v221_v8 = vmul.f32 0.38439733, %v205_v5  ;;  %v213_v14 = vmul.f32 0.30780134, %v205_v5  ;;  %s646_s25 = scalar_lea.vmem %s678_s1, %s398_s22 }
  0x45   : > { %272 = vrot.lane.b32.xlu1 %v207_v3, %s510_s20 }
  0x46   : > { %270 = vrot.lane.b32.xlu0 %v206_v4, %s510_s20 }
  0x49   : > { %244 = vrot.lane.b32.xlu1 %v221_v8, %s509_s15 }
  0x4a   : > { %242 = vrot.lane.b32.xlu0 %v220_v9, %s509_s15 }
  0x4d   : > { %276 = vrot.lane.b32.xlu1 %v209_v10, %s510_s20 }
  0x4e   : > { %274 = vrot.lane.b32.xlu0 %v208_v11, %s510_s20 }
  0x51   : > { %280 = vrot.lane.b32.xlu1 %v211_v12, %s510_s20 }
  0x52   : > { %278 = vrot.lane.b32.xlu0 %v210_v13, %s510_s20 }
  0x55   : > { %284 = vrot.lane.b32.xlu1 %v213_v14, %s510_s20 }
  0x56   : > { %282 = vrot.lane.b32.xlu0 %v212_v15, %s510_s20 }
  0xab   : > { %v235_v17 = vpop.permute.xlu1 %234 }
  0xac   : > { %v231_v18 = vpop.permute.xlu0 %230  ;;  %v256_v31 = vadd.f32 %v235_v17, %v208_v11 }
  0xad   : > { %v254_v23 = vadd.f32 %v231_v18, %v206_v4 }
  0xaf   : > { %v237_v19 = vpop.permute.xlu1 %236 }
  0xb0   : > { %v233_v20 = vpop.permute.xlu0 %232  ;;  %v257_v30 = vadd.f32 %v237_v19, %v209_v10 }
  0xb1   : > { %v255_v22 = vadd.f32 %v233_v20, %v207_v3 }
  0xb3   : > { %v241_v21 = vpop.permute.xlu1 %240 }
  0xb4   : > { %v239_v16 = vpop.permute.xlu0 %238  ;;  %v259_v36 = vadd.f32 %v241_v21, %v211_v12 }
  0xb5   : > { %v258_v37 = vadd.f32 %v239_v16, %v210_v13 }
  0xb7   : > { %v273_v24 = vpop.permute.xlu1 %272 }
  0xb8   : > { %v295_v25 = vadd.f32 %v273_v24, %v255_v22  ;;  %v271_v26 = vpop.permute.xlu0 %270 }
  0xb9   : > { %v294_v27 = vadd.f32 %v271_v26, %v254_v23 }
  0xba   : > { %305 = vst.msk [vmem:[%s646_s25 + $0x8] sm:$0x3f] %vm304_vm0, %v295_v25 }
  0xbb   : > { %303 = vst.msk [vmem:[%s646_s25] sm:$0xff] %vm302_vm1, %v294_v27  ;;  %v245_v28 = vpop.permute.xlu1 %244 }
  0xbc   : > { %v243_v29 = vpop.permute.xlu0 %242  ;;  %v261_v42 = vadd.f32 %v245_v28, %v213_v14 }
  0xbd   : > { %v260_v43 = vadd.f32 %v243_v29, %v212_v15 }
  0xbf   : > { %v277_v32 = vpop.permute.xlu1 %276 }
  0xc0   : > { %v297_v33 = vadd.f32 %v277_v32, %v257_v30  ;;  %v275_v34 = vpop.permute.xlu0 %274 }
  0xc1   : > { %v296_v35 = vadd.f32 %v275_v34, %v256_v31 }
  0xc2   : > { %307 = vst.msk [vmem:[%s646_s25 + $0x18] sm:$0x3f] %vm304_vm0, %v297_v33 }
  0xc3   : > { %306 = vst.msk [vmem:[%s646_s25 + $0x10] sm:$0xff] %vm302_vm1, %v296_v35  ;;  %v281_v38 = vpop.permute.xlu1 %280 }
  0xc4   : > { %v299_v39 = vadd.f32 %v281_v38, %v259_v36  ;;  %v279_v40 = vpop.permute.xlu0 %278 }
  0xc5   : > { %v298_v41 = vadd.f32 %v279_v40, %v258_v37 }
  0xc6   : > { %309 = vst.msk [vmem:[%s646_s25 + $0x28] sm:$0x3f] %vm304_vm0, %v299_v39 }
  0xc7   : > { %308 = vst.msk [vmem:[%s646_s25 + $0x20] sm:$0xff] %vm302_vm1, %v298_v41  ;;  %v285_v44 = vpop.permute.xlu1 %284 }
  0xc8   : > { %v301_v45 = vadd.f32 %v285_v44, %v261_v42  ;;  %v283_v46 = vpop.permute.xlu0 %282 }
  0xc9   : > { %v300_v47 = vadd.f32 %v283_v46, %v260_v43 }
  0xca   : > { %311 = vst.msk [vmem:[%s646_s25 + $0x38] sm:$0x3f] %vm304_vm0, %v301_v45 }
  0xcb   : > { %310 = vst.msk [vmem:[%s646_s25 + $0x30] sm:$0xff] %vm302_vm1, %v300_v47 }
  0xcc PF: > { %p11_p9 = scmp.ge.s32.totalorder %s541_s11, 4   ;;  %s684_s6 = smov %s496_s7 }
  0xcd   : > { %s685_s7 = smov %s500_s8  ;;  %s686_s8 = smov %s551_s14 }
  0xce   : > { %s687_s9 = smov %s541_s11  ;;  %13 = sbr.rel (!%p11_p9) target bundleno = 3 (0x3), region = 64 }
  0xd3   :  { %336 = vsyncpa [#allocation3], 1 }
  0xd4   :  { %338 = vsyncpa [#allocation3 + $0x1], 1 }

</bundles_post_ra>
